<compile_context>
chip_gen: v5e
topology: v5e:2x2
jax: 0.10.0
libtpu: 0.0.40
codegen_flags: <defaults>
</compile_context>

<pallas_src>
import math

import jax
import jax.numpy as jnp
from jax import lax
from jax.experimental import pallas as pl
from jax.experimental.pallas import tpu as pltpu


LANE = 128  # lane width; proj output padded to this for lane-dense stores


# ----------------------------------------------------------------------------
# Fused per-batch kernel: encoder layer + segment mean-pool + projection.
# Grid = (B,); each step handles one batch item.
# ----------------------------------------------------------------------------
def _make_fused_kernel(S, E, H):
    def kernel(x_ref, bias_ref, pool_ref, invc_ref,
               wqkv_ref, wo_ref, w1_ref, w2_ref, wp_ref, bp_ref, o_ref):
        x = x_ref[0]                                  # (S, H) bf16
        xf = x.astype(jnp.float32)                    # residual path in f32

        # ---- fused QKV projection (1/sqrt(H) pre-folded into wq cols) ----
        qkv = jnp.dot(x, wqkv_ref[...],
                      preferred_element_type=jnp.float32)        # (S, 3H)
        q = qkv[:, 0:H]
        k = qkv[:, H:2 * H]
        v = qkv[:, 2 * H:3 * H]

        # ---- attention for this batch item, key-padding bias is additive ---
        scores = lax.dot_general(
            q.astype(jnp.bfloat16), k.astype(jnp.bfloat16),
            (((1,), (1,)), ((), ())),
            preferred_element_type=jnp.float32)                  # (S, S)
        scores = scores + bias_ref[0]                            # (1, S) bcast
        scores = scores - jnp.max(scores, axis=-1, keepdims=True)
        p = jnp.exp(scores)
        p = p / jnp.sum(p, axis=-1, keepdims=True)               # exact softmax

        attn = jnp.dot(p.astype(jnp.bfloat16), v.astype(jnp.bfloat16),
                       preferred_element_type=jnp.float32)       # (S, H)
        h = xf + jnp.dot(attn.astype(jnp.bfloat16), wo_ref[...],
                         preferred_element_type=jnp.float32)

        ff = jnp.maximum(
            jnp.dot(h.astype(jnp.bfloat16), w1_ref[...],
                    preferred_element_type=jnp.float32), 0.0)    # (S, F)
        hidden = h + jnp.dot(ff.astype(jnp.bfloat16), w2_ref[...],
                             preferred_element_type=jnp.float32)  # (S, H)

        # ---- process_encoder_outputs: segment mean-pool (one-hot matmul) ---
        sums = jnp.dot(pool_ref[0], hidden.astype(jnp.bfloat16),
                       preferred_element_type=jnp.float32)       # (E, H)
        mean = sums * invc_ref[0]                                # (E, 1) f32

        # ---- proj_layer: y = mean @ W^T + b, lane-dense Lp=128 output ----
        logits = jnp.dot(mean.astype(jnp.bfloat16), wp_ref[...],
                         preferred_element_type=jnp.float32) + bp_ref[...]
        o_ref[0] = logits                                        # (E, Lp)

    return kernel


# ----------------------------------------------------------------------------
# PretrainedClassifier forward (glue + gridded pallas_call)
# ----------------------------------------------------------------------------
def pretrained_classifier_forward(params, input_ids, input_mask, example_mask,
                                  num_examples, num_labels):
    B, S = input_ids.shape
    H = params["emb"].shape[1]
    F = params["w1"].shape[1]
    E = num_examples
    Lp = params["proj_w_pad"].shape[1]

    # encoder embedding lookup (gather stays outside the kernel), bf16 stream
    x = jnp.take(params["emb"], input_ids, axis=0).astype(jnp.bfloat16)

    # key-padding additive bias, precomputed: 0 for valid keys, -1e9 for pad
    bias = jnp.where(input_mask > 0, 0.0, -1e9).astype(
        jnp.float32).reshape(B, 1, S)

    # pooling one-hot (B, E, S) and exact f32 inverse counts (B, E, 1),
    # precomputed so the kernel does no iota / mod / compare work.
    ex = example_mask.astype(jnp.int32)                          # (B, S)
    eidx = jnp.arange(E, dtype=jnp.int32).reshape(1, E, 1)
    onehot = (ex[:, None, :] == eidx)                            # (B, E, S)
    counts = jnp.sum(onehot, axis=-1, keepdims=True).astype(jnp.float32)
    inv_counts = 1.0 / jnp.maximum(counts, 1.0)                  # (B, E, 1)
    pool = onehot.astype(jnp.bfloat16)

    kernel = _make_fused_kernel(S, E, H)

    # per-batch streamed operands
    stream = lambda bs: pl.BlockSpec(bs, lambda b: (b, 0, 0))
    # VMEM-resident weights (same block every grid step)
    resident = lambda bs: pl.BlockSpec(bs, lambda b: (0, 0))

    out = pl.pallas_call(
        kernel,
        out_shape=jax.ShapeDtypeStruct((B, E, Lp), jnp.float32),
        grid_spec=pltpu.PrefetchScalarGridSpec(
            num_scalar_prefetch=0,
            grid=(B,),
            in_specs=[
                stream((1, S, H)),        # x
                stream((1, 1, S)),        # key-padding bias
                stream((1, E, S)),        # pooling one-hot
                stream((1, E, 1)),        # inverse counts
                resident((H, 3 * H)),     # wqkv
                resident((H, H)),         # wo
                resident((H, F)),         # w1
                resident((F, H)),         # w2
                resident((H, Lp)),        # proj weight (padded)
                resident((1, Lp)),        # proj bias   (padded)
            ],
            out_specs=pl.BlockSpec((1, E, Lp), lambda b: (b, 0, 0)),
        ),
        compiler_params=pltpu.CompilerParams(
            dimension_semantics=("parallel",)),
    )(x, bias, pool, inv_counts, params["wqkv"], params["wo"], params["w1"],
      params["w2"], params["proj_w_pad"], params["proj_b_pad"])

    # torch.cat(example_arr, dim=0) -> (B*E, L); drop lane padding here.
    return out.reshape(B * E, Lp)[:, :num_labels]


def init_params(key, vocab, H, F, L):
    ks = jax.random.split(key, 9)
    s = 0.02
    scale = 1.0 / math.sqrt(float(H))
    wq = s * jax.random.normal(ks[1], (H, H), jnp.float32) * scale  # fold scale
    wk = s * jax.random.normal(ks[2], (H, H), jnp.float32)
    wv = s * jax.random.normal(ks[3], (H, H), jnp.float32)
    proj_w_t = s * jax.random.normal(ks[7], (H, L), jnp.float32)    # (H, L)=W^T
    proj_b = s * jax.random.normal(ks[8], (1, L), jnp.float32)
    Lp = max(LANE, L)
    return {
        "emb": s * jax.random.normal(ks[0], (vocab, H), jnp.float32),
        # fused QKV weight (H, 3H); bf16 matmul operands, f32 accumulation
        "wqkv": jnp.concatenate([wq, wk, wv], axis=1).astype(jnp.bfloat16),
        "wo": (s * jax.random.normal(ks[4], (H, H), jnp.float32)
               ).astype(jnp.bfloat16),
        "w1": (s * jax.random.normal(ks[5], (H, F), jnp.float32)
               ).astype(jnp.bfloat16),
        "w2": (s * jax.random.normal(ks[6], (F, H), jnp.float32)
               ).astype(jnp.bfloat16),
        # proj weight/bias zero-padded once to Lp=128 lanes (lane-dense stores)
        "proj_w_pad": jnp.pad(proj_w_t, ((0, 0), (0, Lp - L))
                              ).astype(jnp.bfloat16),
        "proj_b_pad": jnp.pad(proj_b, ((0, 0), (0, Lp - L))),
    }


if __name__ == "__main__":
    # MXU/lane-aligned hidden sizes (H, F multiples of 128) at small scale.
    B, S, H, F = 2, 8, 128, 256
    vocab = 50
    num_labels = 16
    E = 4  # examples per batch item (each idx 0..E-1 appears in example_mask)

    key = jax.random.PRNGKey(0)
    kp, kid = jax.random.split(key)
    params = init_params(kp, vocab, H, F, num_labels)

    input_ids = jax.random.randint(kid, (B, S), 0, vocab, dtype=jnp.int32)
    # attention mask: last position of each sequence is padding
    input_mask = jnp.array([[1, 1, 1, 1, 1, 1, 1, 0],
                            [1, 1, 1, 1, 1, 1, 1, 0]], dtype=jnp.int32)
    # example mask: -1 = unlabeled token, otherwise example index 0..E-1
    example_mask = jnp.array([[-1, 0, 0, 1, 2, 2, 3, -1],
                              [0, 0, 1, 1, 2, 3, 3, -1]], dtype=jnp.int32)

    logits = pretrained_classifier_forward(params, input_ids, input_mask,
                                           example_mask, E, num_labels)
    logits = jax.block_until_ready(logits)
    assert logits.shape == (B * E, num_labels)
    assert bool(jnp.all(jnp.isfinite(logits)))
    print("KERNEL_OK")
</pallas_src>

<mosaic_0001>
module attributes {stable_mosaic.version = 11 : i64} {
  func.func @kernel(%arg0: i32, %arg1: memref<1x8x128xbf16, #tpu.memory_space<vmem>>, %arg2: memref<1x1x8xf32, #tpu.memory_space<vmem>>, %arg3: memref<1x4x8xbf16, #tpu.memory_space<vmem>>, %arg4: memref<1x4x1xf32, #tpu.memory_space<vmem>>, %arg5: memref<128x384xbf16, #tpu.memory_space<vmem>>, %arg6: memref<128x128xbf16, #tpu.memory_space<vmem>>, %arg7: memref<128x256xbf16, #tpu.memory_space<vmem>>, %arg8: memref<256x128xbf16, #tpu.memory_space<vmem>>, %arg9: memref<128x128xbf16, #tpu.memory_space<vmem>>, %arg10: memref<1x128xf32, #tpu.memory_space<vmem>>, %arg11: memref<1x4x128xf32, #tpu.memory_space<vmem>>) attributes {dimension_semantics = [#tpu.dimension_semantics<parallel>], iteration_bounds = array<i64: 2>, scalar_prefetch = 0 : i64, scratch_operands = 0 : i64, tpu.core_type = #tpu.core_type<tc>, window_params = [{transform_indices = @transform_0, window_bounds = array<i64: 1, 8, 128>}, {transform_indices = @transform_1, window_bounds = array<i64: 1, 1, 8>}, {transform_indices = @transform_2, window_bounds = array<i64: 1, 4, 8>}, {transform_indices = @transform_3, window_bounds = array<i64: 1, 4, 1>}, {pipeline_mode = #tpu.pipeline_mode<synchronous>, transform_indices = @transform_4, window_bounds = array<i64: 128, 384>}, {pipeline_mode = #tpu.pipeline_mode<synchronous>, transform_indices = @transform_5, window_bounds = array<i64: 128, 128>}, {pipeline_mode = #tpu.pipeline_mode<synchronous>, transform_indices = @transform_6, window_bounds = array<i64: 128, 256>}, {pipeline_mode = #tpu.pipeline_mode<synchronous>, transform_indices = @transform_7, window_bounds = array<i64: 256, 128>}, {pipeline_mode = #tpu.pipeline_mode<synchronous>, transform_indices = @transform_8, window_bounds = array<i64: 128, 128>}, {pipeline_mode = #tpu.pipeline_mode<synchronous>, transform_indices = @transform_9, window_bounds = array<i64: 1, 128>}, {transform_indices = @transform_10, window_bounds = array<i64: 1, 4, 128>}]} {
    %c0 = arith.constant 0 : index
    %c0_0 = arith.constant 0 : index
    %c0_1 = arith.constant 0 : index
    %0 = vector.load %arg1[%c0, %c0_0, %c0_1] : memref<1x8x128xbf16, #tpu.memory_space<vmem>>, vector<1x8x128xbf16>
    %1 = vector.shape_cast %0 : vector<1x8x128xbf16> to vector<8x128xbf16>
    %2 = arith.extf %1 : vector<8x128xbf16> to vector<8x128xf32>
    %c0_2 = arith.constant 0 : index
    %c0_3 = arith.constant 0 : index
    %3 = vector.load %arg5[%c0_2, %c0_3] : memref<128x384xbf16, #tpu.memory_space<vmem>>, vector<128x384xbf16>
    %cst = arith.constant dense<0.000000e+00> : vector<8x384xf32>
    %4 = tpu.matmul %1, %3, %cst {dimension_numbers = #tpu.dot_dimension_numbers<[1], [0], [0], [1], [0, 0, 1, 1], [], []>} : vector<8x128xbf16>, vector<128x384xbf16>, vector<8x384xf32> -> vector<8x384xf32>
    %5 = vector.extract_strided_slice %4 {offsets = [0, 0], sizes = [8, 128], strides = [1, 1]} : vector<8x384xf32> to vector<8x128xf32>
    %6 = vector.extract_strided_slice %4 {offsets = [0, 128], sizes = [8, 128], strides = [1, 1]} : vector<8x384xf32> to vector<8x128xf32>
    %7 = vector.extract_strided_slice %4 {offsets = [0, 256], sizes = [8, 128], strides = [1, 1]} : vector<8x384xf32> to vector<8x128xf32>
    %8 = arith.truncf %5 : vector<8x128xf32> to vector<8x128xbf16>
    %9 = arith.truncf %6 : vector<8x128xf32> to vector<8x128xbf16>
    %cst_4 = arith.constant dense<0.000000e+00> : vector<8x8xf32>
    %10 = tpu.matmul %8, %9, %cst_4 {dimension_numbers = #tpu.dot_dimension_numbers<[1], [1], [0], [0], [0, 0, 1, 0], [], []>} : vector<8x128xbf16>, vector<8x128xbf16>, vector<8x8xf32> -> vector<8x8xf32>
    %c0_5 = arith.constant 0 : index
    %c0_6 = arith.constant 0 : index
    %c0_7 = arith.constant 0 : index
    %11 = vector.load %arg2[%c0_5, %c0_6, %c0_7] : memref<1x1x8xf32, #tpu.memory_space<vmem>>, vector<1x1x8xf32>
    %12 = vector.shape_cast %11 : vector<1x1x8xf32> to vector<1x8xf32>
    %13 = vector.broadcast %12 : vector<1x8xf32> to vector<8x8xf32>
    %14 = arith.addf %10, %13 : vector<8x8xf32>
    %cst_8 = arith.constant dense<0xFF800000> : vector<8xf32>
    %15 = vector.multi_reduction <maximumf>, %14, %cst_8 [1] : vector<8x8xf32> to vector<8xf32>
    %16 = vector.shape_cast %15 : vector<8xf32> to vector<8x1xf32>
    %17 = vector.broadcast %16 : vector<8x1xf32> to vector<8x8xf32>
    %18 = arith.subf %14, %17 : vector<8x8xf32>
    %19 = math.exp %18 : vector<8x8xf32>
    %cst_9 = arith.constant dense<0.000000e+00> : vector<8xf32>
    %20 = vector.multi_reduction <add>, %19, %cst_9 [1] : vector<8x8xf32> to vector<8xf32>
    %21 = vector.shape_cast %20 : vector<8xf32> to vector<8x1xf32>
    %22 = vector.broadcast %21 : vector<8x1xf32> to vector<8x8xf32>
    %23 = arith.divf %19, %22 : vector<8x8xf32>
    %24 = arith.truncf %23 : vector<8x8xf32> to vector<8x8xbf16>
    %25 = arith.truncf %7 : vector<8x128xf32> to vector<8x128xbf16>
    %cst_10 = arith.constant dense<0.000000e+00> : vector<8x128xf32>
    %26 = tpu.matmul %24, %25, %cst_10 {dimension_numbers = #tpu.dot_dimension_numbers<[1], [0], [0], [1], [0, 0, 1, 1], [], []>} : vector<8x8xbf16>, vector<8x128xbf16>, vector<8x128xf32> -> vector<8x128xf32>
    %27 = arith.truncf %26 : vector<8x128xf32> to vector<8x128xbf16>
    %c0_11 = arith.constant 0 : index
    %c0_12 = arith.constant 0 : index
    %28 = vector.load %arg6[%c0_11, %c0_12] : memref<128x128xbf16, #tpu.memory_space<vmem>>, vector<128x128xbf16>
    %cst_13 = arith.constant dense<0.000000e+00> : vector<8x128xf32>
    %29 = tpu.matmul %27, %28, %cst_13 {dimension_numbers = #tpu.dot_dimension_numbers<[1], [0], [0], [1], [0, 0, 1, 1], [], []>} : vector<8x128xbf16>, vector<128x128xbf16>, vector<8x128xf32> -> vector<8x128xf32>
    %30 = arith.addf %2, %29 : vector<8x128xf32>
    %31 = arith.truncf %30 : vector<8x128xf32> to vector<8x128xbf16>
    %c0_14 = arith.constant 0 : index
    %c0_15 = arith.constant 0 : index
    %32 = vector.load %arg7[%c0_14, %c0_15] : memref<128x256xbf16, #tpu.memory_space<vmem>>, vector<128x256xbf16>
    %cst_16 = arith.constant dense<0.000000e+00> : vector<8x256xf32>
    %33 = tpu.matmul %31, %32, %cst_16 {dimension_numbers = #tpu.dot_dimension_numbers<[1], [0], [0], [1], [0, 0, 1, 1], [], []>} : vector<8x128xbf16>, vector<128x256xbf16>, vector<8x256xf32> -> vector<8x256xf32>
    %cst_17 = arith.constant 0.000000e+00 : f32
    %34 = vector.broadcast %cst_17 : f32 to vector<8x256xf32>
    %35 = arith.maximumf %33, %34 : vector<8x256xf32>
    %36 = arith.truncf %35 : vector<8x256xf32> to vector<8x256xbf16>
    %c0_18 = arith.constant 0 : index
    %c0_19 = arith.constant 0 : index
    %37 = vector.load %arg8[%c0_18, %c0_19] : memref<256x128xbf16, #tpu.memory_space<vmem>>, vector<256x128xbf16>
    %cst_20 = arith.constant dense<0.000000e+00> : vector<8x128xf32>
    %38 = tpu.matmul %36, %37, %cst_20 {dimension_numbers = #tpu.dot_dimension_numbers<[1], [0], [0], [1], [0, 0, 1, 1], [], []>} : vector<8x256xbf16>, vector<256x128xbf16>, vector<8x128xf32> -> vector<8x128xf32>
    %39 = arith.addf %30, %38 : vector<8x128xf32>
    %c0_21 = arith.constant 0 : index
    %c0_22 = arith.constant 0 : index
    %c0_23 = arith.constant 0 : index
    %40 = vector.load %arg3[%c0_21, %c0_22, %c0_23] : memref<1x4x8xbf16, #tpu.memory_space<vmem>>, vector<1x4x8xbf16>
    %41 = vector.shape_cast %40 : vector<1x4x8xbf16> to vector<4x8xbf16>
    %42 = arith.truncf %39 : vector<8x128xf32> to vector<8x128xbf16>
    %cst_24 = arith.constant dense<0.000000e+00> : vector<4x128xf32>
    %43 = tpu.matmul %41, %42, %cst_24 {dimension_numbers = #tpu.dot_dimension_numbers<[1], [0], [0], [1], [0, 0, 1, 1], [], []>} : vector<4x8xbf16>, vector<8x128xbf16>, vector<4x128xf32> -> vector<4x128xf32>
    %c0_25 = arith.constant 0 : index
    %c0_26 = arith.constant 0 : index
    %c0_27 = arith.constant 0 : index
    %44 = vector.load %arg4[%c0_25, %c0_26, %c0_27] : memref<1x4x1xf32, #tpu.memory_space<vmem>>, vector<1x4x1xf32>
    %45 = vector.shape_cast %44 : vector<1x4x1xf32> to vector<4x1xf32>
    %46 = vector.broadcast %45 : vector<4x1xf32> to vector<4x128xf32>
    %47 = arith.mulf %43, %46 : vector<4x128xf32>
    %48 = arith.truncf %47 : vector<4x128xf32> to vector<4x128xbf16>
    %c0_28 = arith.constant 0 : index
    %c0_29 = arith.constant 0 : index
    %49 = vector.load %arg9[%c0_28, %c0_29] : memref<128x128xbf16, #tpu.memory_space<vmem>>, vector<128x128xbf16>
    %cst_30 = arith.constant dense<0.000000e+00> : vector<4x128xf32>
    %50 = tpu.matmul %48, %49, %cst_30 {dimension_numbers = #tpu.dot_dimension_numbers<[1], [0], [0], [1], [0, 0, 1, 1], [], []>} : vector<4x128xbf16>, vector<128x128xbf16>, vector<4x128xf32> -> vector<4x128xf32>
    %c0_31 = arith.constant 0 : index
    %c0_32 = arith.constant 0 : index
    %51 = vector.load %arg10[%c0_31, %c0_32] : memref<1x128xf32, #tpu.memory_space<vmem>>, vector<1x128xf32>
    %52 = vector.broadcast %51 : vector<1x128xf32> to vector<4x128xf32>
    %53 = arith.addf %50, %52 : vector<4x128xf32>
    %c0_33 = arith.constant 0 : index
    %c0_34 = arith.constant 0 : index
    %c0_35 = arith.constant 0 : index
    %54 = vector.load %arg11[%c0_33, %c0_34, %c0_35] : memref<1x4x128xf32, #tpu.memory_space<vmem>>, vector<1x4x128xf32>
    %55 = vector.shape_cast %54 : vector<1x4x128xf32> to vector<4x128xf32>
    %56 = vector.shape_cast %53 : vector<4x128xf32> to vector<1x4x128xf32>
    tpu.vector_store %arg11[%c0_33, %c0_34, %c0_35], %56 {strides = array<i32>} : memref<1x4x128xf32, #tpu.memory_space<vmem>>, vector<1x4x128xf32>,
    return
  }
  func.func @transform_0(%arg0: i32) -> (i32, i32, i32) {
    %c0_i32 = arith.constant 0 : i32
    %c0_i32_0 = arith.constant 0 : i32
    %c0_i32_1 = arith.constant 0 : i32
    return %arg0, %c0_i32, %c0_i32_0 : i32, i32, i32
  }
  func.func @transform_1(%arg0: i32) -> (i32, i32, i32) {
    %c0_i32 = arith.constant 0 : i32
    %c0_i32_0 = arith.constant 0 : i32
    %c0_i32_1 = arith.constant 0 : i32
    return %arg0, %c0_i32, %c0_i32_0 : i32, i32, i32
  }
  func.func @transform_2(%arg0: i32) -> (i32, i32, i32) {
    %c0_i32 = arith.constant 0 : i32
    %c0_i32_0 = arith.constant 0 : i32
    %c0_i32_1 = arith.constant 0 : i32
    return %arg0, %c0_i32, %c0_i32_0 : i32, i32, i32
  }
  func.func @transform_3(%arg0: i32) -> (i32, i32, i32) {
    %c0_i32 = arith.constant 0 : i32
    %c0_i32_0 = arith.constant 0 : i32
    %c0_i32_1 = arith.constant 0 : i32
    return %arg0, %c0_i32, %c0_i32_0 : i32, i32, i32
  }
  func.func @transform_4(%arg0: i32) -> (i32, i32) {
    %c0_i32 = arith.constant 0 : i32
    %c0_i32_0 = arith.constant 0 : i32
    %c0_i32_1 = arith.constant 0 : i32
    return %c0_i32, %c0_i32_0 : i32, i32
  }
  func.func @transform_5(%arg0: i32) -> (i32, i32) {
    %c0_i32 = arith.constant 0 : i32
    %c0_i32_0 = arith.constant 0 : i32
    %c0_i32_1 = arith.constant 0 : i32
    return %c0_i32, %c0_i32_0 : i32, i32
  }
  func.func @transform_6(%arg0: i32) -> (i32, i32) {
    %c0_i32 = arith.constant 0 : i32
    %c0_i32_0 = arith.constant 0 : i32
    %c0_i32_1 = arith.constant 0 : i32
    return %c0_i32, %c0_i32_0 : i32, i32
  }
  func.func @transform_7(%arg0: i32) -> (i32, i32) {
    %c0_i32 = arith.constant 0 : i32
    %c0_i32_0 = arith.constant 0 : i32
    %c0_i32_1 = arith.constant 0 : i32
    return %c0_i32, %c0_i32_0 : i32, i32
  }
  func.func @transform_8(%arg0: i32) -> (i32, i32) {
    %c0_i32 = arith.constant 0 : i32
    %c0_i32_0 = arith.constant 0 : i32
    %c0_i32_1 = arith.constant 0 : i32
    return %c0_i32, %c0_i32_0 : i32, i32
  }
  func.func @transform_9(%arg0: i32) -> (i32, i32) {
    %c0_i32 = arith.constant 0 : i32
    %c0_i32_0 = arith.constant 0 : i32
    %c0_i32_1 = arith.constant 0 : i32
    return %c0_i32, %c0_i32_0 : i32, i32
  }
  func.func @transform_10(%arg0: i32) -> (i32, i32, i32) {
    %c0_i32 = arith.constant 0 : i32
    %c0_i32_0 = arith.constant 0 : i32
    %c0_i32_1 = arith.constant 0 : i32
    return %arg0, %c0_i32, %c0_i32_0 : i32, i32, i32
  }
}

</mosaic_0001>

<bundles_post_ra>
// kernel: tpu_custom_call.1
= control target key start
LH: loop header
LB: loop body
LE: loop exit
PB: predicated region body
PF: predicated region fallthrough
CT: control target
= control target key end

     0   :  { %s2453_s0 = inlined_call_operand.vmem [shape: bf16[2,8,128], index: 0, kind: input, shape index: {}]   ;;  %s2454_s1 = inlined_call_operand.vmem [shape: f32[2,1,8], index: 1, kind: input, shape index: {}]   ;;  %s2455_s2 = inlined_call_operand.hbm [shape: bf16[2,4,8], index: 2, kind: input, shape index: {}]   ;;  %s2456_s3 = inlined_call_operand.vmem [shape: f32[2,4,1], index: 3, kind: input, shape index: {}]   ;;  %s2457_s4 = inlined_call_operand.hbm [shape: bf16[128,384], index: 4, kind: input, shape index: {}]   ;;  %s2458_s5 = inlined_call_operand.hbm [shape: bf16[128,128], index: 5, kind: input, shape index: {}]   ;;  %s2459_s6 = inlined_call_operand.hbm [shape: bf16[128,256], index: 6, kind: input, shape index: {}]   ;;  %s2460_s7 = inlined_call_operand.hbm [shape: bf16[256,128], index: 7, kind: input, shape index: {}]   ;;  %s2461_s8 = inlined_call_operand.hbm [shape: bf16[128,128], index: 8, kind: input, shape index: {}]   ;;  %s2462_s9 = inlined_call_operand.vmem [shape: f32[1,128], index: 9, kind: input, shape index: {}]   ;;  %s2463_s10 = inlined_call_operand.hbm [shape: f32[2,4,128], index: 10, kind: output, shape index: {}]  }
   0x1   :  { %2464 = sst [smem:[#allocation19_spill]] %s2457_s4 }
   0x2   :  { %2465 = sst [smem:[#allocation20_spill]] %s2458_s5 }
   0x3   :  { %2466 = sst [smem:[#allocation21_spill]] %s2459_s6 }
   0x4   :  { %2467 = sst [smem:[#allocation22_spill]] %s2460_s7 }
   0x5   :  { %15 = vsyncpa [#allocation3], 0 }
   0x6   :  { %17 = vsyncpa [#allocation3 + $0x1], 0 }
   0x7   :  { %18 = vsyncpa [#allocation6], 0 }
   0x8   :  { %19 = vsyncpa [#allocation9], 0 }
   0x9   :  { %20 = vsyncpa [#allocation12], 0 }
   0xa   :  { %21 = vsyncpa [#allocation4], 0 }
   0xb   :  { %23 = vsyncpa [#allocation4 + $0x1], 0  ;;  %s2240_s13 = smov 0   ;;  %s2242_s14 = smov 0  }
   0xc   :  { %s2244_s15 = smov 0   ;;  %s2246_s16 = smov 0  }
   0xd LB: > { %s2468_s4 = sld [smem:[#allocation19_spill]]  ;;  %s2264_s20 = sadd.s32 4294967295, %s2171_s16   ;;  %s2171_s16 = sphi %s2246_s16, %s2482_s16   ;;  %s2167_s15 = sphi %s2244_s15, %s2481_s15   ;;  %s2163_s14 = sphi %s2242_s14, %s2480_s14   ;;  %s2159_s13 = sphi %s2240_s13, %s2479_s13  }
   0xe   : > { %p1416_p0 = scmp.ge.s32.totalorder %s2171_s16, 1  ;;  %p102_p1 = scmp.eq.s32.totalorder %s2264_s20, 0 }
   0xf   : > { %p290_p2 = scmp.lt.s32.totalorder %s2171_s16, 3  ;;  %s2173_s22 = smov [#allocation5]  }
  0x10   : > { %s303_s23 = sshll.u32 %s2173_s22, 4  ;;  %s2470_s6 = sld [smem:[#allocation21_spill]]  ;;  %s304_s23 = int_to_ptr.vmem [resolvable:$true] %s303_s23 }
  0x11   : > { %p2269_p3 = pnand %p1416_p0, %p290_p2  ;;  %s2174_s28 = smov [#allocation8]  }
  0x12   : > { %s331_s29 = sshll.u32 %s2174_s28, 4  ;;  %s2175_s30 = smov 192   ;;  %s332_s29 = int_to_ptr.vmem [resolvable:$true] %s331_s29 }
  0x13   : > { %s301_s19 = sshll.u32 %s2468_s4, 4  ;;  %p1825_p4 = pneg %p2269_p3  ;;  %s302_s19 = int_to_ptr.hbm [resolvable:$true] %s301_s19 }
  0x14   : > { %s2176_s11 = smov 12   ;;  %s2177_s12 = smov 128  }
  0x15   : > { %p2281_p6 = pnand %p1825_p4, %p102_p1  ;;  %s2178_s17 = smov 8  }
  0x16   : > { %s329_s26 = sshll.u32 %s2470_s6, 4  ;;  %s2472_s5 = sld [smem:[#allocation20_spill]]  ;;  %s330_s26 = int_to_ptr.hbm [resolvable:$true] %s329_s26 }
  0x17   : > { %1828 = dma.hbm_to_vmem [thread:$0]  (!%p2281_p6), %s302_s19, 3072, %s304_s23, [#allocation6], %s2175_s30, %s2175_s30, %s2176_s11  }
  0x18   : > { %1834 = dma.hbm_to_vmem [thread:$0]  (!%p2281_p6), %s330_s26, 2048, %s332_s29, [#allocation9], %s2177_s12, %s2177_s12, %s2178_s17  }
  0x19   : > { %s2179_s25 = smov [#allocation7]   ;;  %s2473_s7 = sld [smem:[#allocation22_spill]] }
  0x1a   : > { %s317_s4 = sshll.u32 %s2179_s25, 4  ;;  %s2180_s23 = smov 64   ;;  %s318_s4 = int_to_ptr.vmem [resolvable:$true] %s317_s4 }
  0x1b   : > { %s2181_s30 = smov 4   ;;  %s2182_s26 = smov [#allocation10]  }
  0x1c   : > { %s315_s24 = sshll.u32 %s2472_s5, 4  ;;  %s345_s29 = sshll.u32 %s2182_s26, 4  ;;  %s316_s24 = int_to_ptr.hbm [resolvable:$true] %s315_s24  ;;  %s346_s29 = int_to_ptr.vmem [resolvable:$true] %s345_s29 }
  0x1d   : > { %1831 = dma.hbm_to_vmem [thread:$0]  (!%p2281_p6), %s316_s24, 1024, %s318_s4, [#allocation6], %s2180_s23, %s2180_s23, %s2181_s30  }
  0x1e   : > { %s357_s6 = sshll.u32 %s2461_s8, 4  ;;  %s2183_s4 = smov [#allocation11]   ;;  %s358_s6 = int_to_ptr.hbm [resolvable:$true] %s357_s6 }
  0x1f   : > { %s343_s19 = sshll.u32 %s2473_s7, 4  ;;  %s359_s17 = sshll.u32 %s2183_s4, 4  ;;  %s344_s19 = int_to_ptr.hbm [resolvable:$true] %s343_s19  ;;  %s360_s17 = int_to_ptr.vmem [resolvable:$true] %s359_s17 }
  0x20   : > { %1837 = dma.hbm_to_vmem [thread:$0]  (!%p2281_p6), %s344_s19, 2048, %s346_s29, [#allocation9], %s2180_s23, %s2180_s23, %s2181_s30  }
  0x21   : > { %1840 = dma.hbm_to_vmem [thread:$0]  (!%p2281_p6), %s358_s6, 1024, %s360_s17, [#allocation12], %s2180_s23, %s2180_s23, %s2181_s30  }
  0x22   : > { %s1415_s18 = sadd.s32 4294967294, %s2171_s16   ;;  %s2306_s22 = sadd.s32 1, %s2171_s16  }
  0x23   : > { %s88_s24 = sadd.s32 1, %s2167_s15  ;;  %s85_s25 = ssub.s32 %s2171_s16, %s2306_s22 }
  0x24   : > { %p95_p7 = scmp.ne.s32.totalorder %s2167_s15, %s2163_s14  ;;  %p86_p8 = scmp.eq.s32.totalorder %s85_s25, 0 }
  0x25   : > { %p96_p9 = scmp.eq.s32.totalorder %s2171_s16, 0  ;;  %p101_p10 = scmp.ne.s32.totalorder %s2163_s14, %s2159_s13 }
  0x26   : > { %p277_p11 = scmp.eq.s32.totalorder %s2264_s20, 1  ;;  %p283_p0 = scmp.eq.s32.totalorder %s1415_s18, 1 }
  0x27   : > { %s2318_s28 = scalar_select %p86_p8, %s2167_s15, %s88_s24  }
  0x28   : > { %p2322_p12 = por %p102_p1, %p101_p10  ;;  %p2326_p13 = por %p277_p11, %p95_p7 }
  0x29   : > { %p97_p2 = por %p96_p9, %p95_p7  ;;  %s389_s23 = sand.u32 1, %s2167_s15  }
  0x2a   : > { %p2331_p4 = por %p283_p0, %p101_p10  ;;  %p1854_p6 = scmp.lt.s32.totalorder %s2171_s16, 2 }
  0x2b   : > { %s1423_s26 = sshll.u32 %s389_s23, 1  ;;  %s1424_s29 = sshll.u32 %s2171_s16, 1 }
  0x2c   : > { %s397_s6 = scalar_lea.hbm %s2455_s2, %s1424_s29  ;;  %s393_s17 = scalar_lea.vmem [#allocation2], %s1423_s26 }
  0x2d   : > { %s399_s4 = sshll.u32 %s397_s6, 4  ;;  %s401_s24 = sshll.u32 %s393_s17, 4  ;;  %s400_s4 = int_to_ptr.hbm [resolvable:$true] %s399_s4  ;;  %s402_s24 = int_to_ptr.vmem [resolvable:$true] %s401_s24 }
  0x2e   : > { %p2340_p8 = pnand %p1854_p6, %p97_p2  ;;  %s390_s25 = scalar_lea.sflag [#allocation3], %s389_s23 }
  0x2f   : > { %s2063_s5 = sshra.s32 %s400_s4, 4  ;;  %s2070_s26 = scalar_lea.hbm %s2455_s2, 4  ;;  %s2064_s5 = int_to_ptr.hbm [resolvable:$true] %s2063_s5 }
  0x30   : > { %s2065_s7 = scalar_lea.hbm %s2064_s5, 2  ;;  %p2067_p9 = pneg %p2340_p8 }
  0x31   : > { %p2066_p7 = scmp.ne.s32.totalorder %s2064_s5, %s2065_s7  ;;  %p2071_p0 = scmp.lt.s32.totalorder %s2064_s5, %s2455_s2 }
  0x32   : > { %p2072_p2 = scmp.lt.s32.totalorder %s2070_s26, %s2065_s7 }
  0x33   : > { %p2068_p10 = pnand %p2067_p9, %p2066_p7 }
  0x34   : > { %p2073_p6 = por %p2072_p2, %p2071_p0 }
  0x35   : > { %p2069_p11 = pneg %p2068_p10 }
  0x37   : > { %p2074_p5 = pnand %p2073_p6, %p2069_p11 }
  0x39   : > { %2077 = shalt.err (!%p2074_p5)
}
  0x3a   : > { %1844 = dma.hbm_to_vmem [thread:$0]  (!%p2340_p8), %s400_s4, 32, %s402_s24, %s390_s25  }
  0x3b   : > { %417 = sbr.rel (%p2269_p3) target bundleno = 1447 (0x5a7), region = 60  ;;  %s2357_s23 = sand.u32 (!%p2269_p3), 1, %s2163_s14  }
  0x3c   : > { %s1426_s17 = sshll.u32 (!%p2269_p3), %s2357_s23, 1  ;;  %s420_s29 = scalar_lea.sflag (!%p2269_p3), [#allocation3], %s2357_s23 }
  0x3d   : > { %s2361_s11 = scalar_lea.vmem (!%p2269_p3), [#allocation2], %s1426_s17 }
  0x40   : > { %2138 = dma.done.wait (%p2322_p12), %s420_s29, 32  }
  0x41   : > { %2140 = vsyncadd (%p2322_p12), %s420_s29, 4294967264 }
  0x42   : > { %2142 = dma.done.wait (%p102_p1), [#allocation6], 4096  }
  0x43   : > { %2144 = vsyncadd (%p102_p1), [#allocation6], 4294963200 }
  0x44   : > { %2146 = dma.done.wait (%p102_p1), [#allocation9], 4096  }
  0x45   : > { %2148 = vsyncadd (%p102_p1), [#allocation9], 4294963200 }
  0x46   : > { %2150 = dma.done.wait (%p102_p1), [#allocation12], 1024  }
  0x47   : > { %2152 = vsyncadd (%p102_p1), [#allocation12], 4294966272  ;;  %v1521_v0 = vld [vmem:[#allocation5 + $0xa8] sm:$0xf]  ;;  %v1751_v1 = vld [vmem:[#allocation5 + $0xb0] sm:$0xf0] }
  0x48   : > { %v1750_v2 = vld [vmem:[#allocation5 + $0xac] sm:$0xf]  ;;  %v1522_v3 = vor.u32 %v1751_v1, %v1521_v0  ;;  %v1523_v4 = vld [vmem:[#allocation5 + $0xb4] sm:$0xf0]  ;;  %v1509_v5 = vld [vmem:[#allocation5 + $0x90] sm:$0xf] }
  0x49   : > { %v1748_v6 = vld [vmem:[#allocation5 + $0x98] sm:$0xf0]  ;;  %v1526_v7 = vor.u32 %v1750_v2, %v1523_v4  ;;  %v1747_v8 = vld [vmem:[#allocation5 + $0x94] sm:$0xf]  ;;  %v1511_v9 = vld [vmem:[#allocation5 + $0x9c] sm:$0xf0] }
  0x4a   : > { %671 = vmatpush.bf16.msra.mxu0 %v1522_v3  ;;  %v1510_v10 = vor.u32 %v1748_v6, %v1509_v5  ;;  %v1514_v11 = vor.u32 %v1747_v8, %v1511_v9  ;;  %v1497_v12 = vld [vmem:[#allocation5 + $0x78] sm:$0xf]  ;;  %v1745_v13 = vld [vmem:[#allocation5 + $0x80] sm:$0xf0]  ;;  %v1744_v14 = vld [vmem:[#allocation5 + $0x7c] sm:$0xf] }
  0x4b   : > { %684 = vmatpush.bf16.msra.mxu1 %v1526_v7  ;;  %v1499_v15 = vld [vmem:[#allocation5 + $0x84] sm:$0xf0]  ;;  %v1498_v16 = vor.u32 %v1745_v13, %v1497_v12  ;;  %v1485_v18 = vld [vmem:[#allocation5 + $0x60] sm:$0xf]  ;;  %v1742_v19 = vld [vmem:[#allocation5 + $0x68] sm:$0xf0] }
  0x4c   : > { %v1502_v17 = vor.u32 %v1744_v14, %v1499_v15  ;;  %v1741_v20 = vld [vmem:[#allocation5 + $0x64] sm:$0xf]  ;;  %v1487_v21 = vld [vmem:[#allocation5 + $0x6c] sm:$0xf0]  ;;  %v1486_v22 = vor.u32 %v1742_v19, %v1485_v18  ;;  %v1473_v24 = vld [vmem:[#allocation5 + $0x48] sm:$0xf] }
  0x4d   : > { %v1490_v23 = vor.u32 %v1741_v20, %v1487_v21  ;;  %v1739_v25 = vld [vmem:[#allocation5 + $0x50] sm:$0xf0]  ;;  %v1738_v26 = vld [vmem:[#allocation5 + $0x4c] sm:$0xf]  ;;  %v1475_v27 = vld [vmem:[#allocation5 + $0x54] sm:$0xf0] }
  0x4e   : > { %672 = vmatpush.bf16.msra.mxu0 %v1510_v10  ;;  %v1474_v28 = vor.u32 %v1739_v25, %v1473_v24  ;;  %v1478_v29 = vor.u32 %v1738_v26, %v1475_v27  ;;  %v1461_v30 = vld [vmem:[#allocation5 + $0x30] sm:$0xf]  ;;  %v1736_v31 = vld [vmem:[#allocation5 + $0x38] sm:$0xf0]  ;;  %v1735_v32 = vld [vmem:[#allocation5 + $0x34] sm:$0xf] }
  0x4f   : > { %685 = vmatpush.bf16.msra.mxu1 %v1514_v11  ;;  %v1463_v33 = vld [vmem:[#allocation5 + $0x3c] sm:$0xf0]  ;;  %p497_p1 = scmp.lt.s32.totalorder %s2264_s20, 1  ;;  %v1462_v34 = vor.u32 %v1736_v31, %v1461_v30  ;;  %v1449_v36 = vld [vmem:[#allocation5 + $0x18] sm:$0xf]  ;;  %vm729_vm0 = vcmask 64512  }
  0x50   : > { %v1466_v35 = vor.u32 %v1735_v32, %v1463_v33  ;;  %v1733_v37 = vld [vmem:[#allocation5 + $0x20] sm:$0xf0]  ;;  %v1732_v38 = vld [vmem:[#allocation5 + $0x1c] sm:$0xf]  ;;  %v1451_v39 = vld [vmem:[#allocation5 + $0x24] sm:$0xf0] }
  0x51   : > { %s2381_s5 = scalar_select %p497_p1, %s2264_s20, 1  ;;  %v1450_v40 = vor.u32 %v1733_v37, %v1449_v36  ;;  %v1454_v41 = vor.u32 %v1732_v38, %v1451_v39  ;;  %v1437_v42 = vld [vmem:[#allocation5] sm:$0xf]  ;;  %v1730_v43 = vld [vmem:[#allocation5 + $0x8] sm:$0xf0]  ;;  %vm759_vm1 = vcmask 1043456  }
  0x52   : > { %673 = vmatpush.bf16.msra.mxu0 %v1498_v16  ;;  %v1729_v44 = vld [vmem:[#allocation5 + $0x4] sm:$0xf]  ;;  %v1439_v45 = vld [vmem:[#allocation5 + $0xc] sm:$0xf0]  ;;  %v1438_v46 = vor.u32 %v1730_v43, %v1437_v42  ;;  %v1752_v56 = vld [vmem:[#allocation5 + $0xb8] sm:$0xf0] }
  0x53   : > { %686 = vmatpush.bf16.msra.mxu1 %v1502_v17  ;;  %s1433_s7 = sshll.u32 %s2381_s5, 2  ;;  %v1442_v47 = vor.u32 %v1729_v44, %v1439_v45  ;;  %s503_s25 = scalar_lea.vmem %s2454_s1, %s2381_s5  ;;  %v1529_v55 = vld [vmem:[#allocation5 + $0xb0] sm:$0xf]  ;;  %v1517_v57 = vld [vmem:[#allocation5 + $0x98] sm:$0xf]  ;;  %v1758_v31 = vld [vmem:[#allocation7 + $0x28] sm:$0xff] }
  0x54   : > { %s500_s4 = scalar_lea.vmem %s2453_s0, %s1433_s7  ;;  %v1530_v58 = vor.u32 %v1752_v56, %v1529_v55  ;;  %v1749_v59 = vld [vmem:[#allocation5 + $0xa0] sm:$0xf0]  ;;  %v1505_v61 = vld [vmem:[#allocation5 + $0x80] sm:$0xf]  ;;  %v1746_v62 = vld [vmem:[#allocation5 + $0x88] sm:$0xf0]  ;;  %s507_s29 = scalar_lea.vmem %s2456_s3, %s1433_s7 }
  0x55   : > { %v2389_v48 = vld [vmem:[%s500_s4] sm:$0xf]  ;;  %v1518_v60 = vor.u32 %v1749_v59, %v1517_v57  ;;  %v1506_v63 = vor.u32 %v1746_v62, %v1505_v61  ;;  %v1493_v0 = vld [vmem:[#allocation5 + $0x68] sm:$0xf]  ;;  %v1743_v1 = vld [vmem:[#allocation5 + $0x70] sm:$0xf0] }
  0x56   : > { %674 = vmatpush.bf16.msra.mxu0 %v1486_v22  ;;  %697 = vmatpush.bf16.msra.mxu2 %v1530_v58  ;;  %v1494_v2 = vor.u32 %v1743_v1, %v1493_v0  ;;  %v1481_v3 = vld [vmem:[#allocation5 + $0x50] sm:$0xf]  ;;  %v1740_v4 = vld [vmem:[#allocation5 + $0x58] sm:$0xf0]  ;;  %v1469_v6 = vld [vmem:[#allocation5 + $0x38] sm:$0xf] }
  0x57   : > { %687 = vmatpush.bf16.msra.mxu1 %v1490_v23  ;;  %v1482_v5 = vor.u32 %v1740_v4, %v1481_v3  ;;  %v1737_v7 = vld [vmem:[#allocation5 + $0x40] sm:$0xf0]  ;;  %v1457_v9 = vld [vmem:[#allocation5 + $0x20] sm:$0xf]  ;;  %v1734_v10 = vld [vmem:[#allocation5 + $0x28] sm:$0xf0] }
  0x58   : > { %v1470_v8 = vor.u32 %v1737_v7, %v1469_v6  ;;  %v1907_v11 = vld [vmem:[%s503_s25] ss:$0 sm:$0xff]  ;;  %v1458_v12 = vor.u32 %v1734_v10, %v1457_v9  ;;  %v1445_v17 = vld [vmem:[#allocation5 + $0x8] sm:$0xf]  ;;  %v1731_v18 = vld [vmem:[#allocation5 + $0x10] sm:$0xf0] }
  0x59   : > { %v1446_v19 = vor.u32 %v1731_v18, %v1445_v17  ;;  %v1759_v30 = vld [vmem:[#allocation7 + $0x30] sm:$0xff]  ;;  %v1757_v33 = vld [vmem:[#allocation7 + $0x20] sm:$0xff]  ;;  %v1754_v42 = vld [vmem:[#allocation7 + $0x8] sm:$0xff]  ;;  %s1726_s5 = sshll.u32 %s2264_s20, 2  ;;  %s1432_s7 = sshll.u32 %s2357_s23, 2 }
  0x5a   : > { %675 = vmatpush.bf16.msra.mxu0 %v1474_v28  ;;  %698 = vmatpush.bf16.msra.mxu2 %v1518_v60  ;;  %v1755_v37 = vld [vmem:[#allocation7 + $0x10] sm:$0xff]  ;;  %v1624_v55 = vld [vmem:[#allocation8 + $0x78] sm:$0xf0]  ;;  %v1614_v56 = vld [vmem:[#allocation8 + $0x60] sm:$0xf]  ;;  %s1259_s4 = scalar_lea.hbm %s2463_s10, %s1726_s5  ;;  %s496_s18 = scalar_lea.vmem [#allocation13], %s1432_s7 }
  0x5b   : > { %688 = vmatpush.bf16.msra.mxu1 %v1478_v29  ;;  %v1760_v29 = vld [vmem:[#allocation7 + $0x38] sm:$0xff]  ;;  %v1774_v57 = vld [vmem:[#allocation8 + $0x64] sm:$0xf0]  ;;  %v1773_v59 = vld [vmem:[#allocation8 + $0x64] sm:$0xf]  ;;  %s1261_s25 = sshll.u32 %s496_s18, 4  ;;  %s1262_s25 = int_to_ptr.vmem [resolvable:$true] %s1261_s25 }
  0x5c   : > { %v1616_v60 = vld [vmem:[#allocation8 + $0x68] sm:$0xf0]  ;;  %v1615_v61 = vor.u32 %v1774_v57, %v1614_v56  ;;  %v1772_v0 = vld [vmem:[#allocation8 + $0x54] sm:$0xf0]  ;;  %v1771_v1 = vld [vmem:[#allocation8 + $0x54] sm:$0xf] }
  0x5d   : > { %v1619_v62 = vor.u32 %v1773_v59, %v1616_v60  ;;  %v1770_v6 = vld [vmem:[#allocation8 + $0x44] sm:$0xf0]  ;;  %v1769_v7 = vld [vmem:[#allocation8 + $0x44] sm:$0xf]  ;;  %v1582_v17 = vld [vmem:[#allocation8 + $0x20] sm:$0xf] }
  0x5e   : > { %676 = vmatpush.bf16.msra.mxu0 %v1462_v34  ;;  %699 = vmatpush.bf16.msra.mxu2 %v1506_v63  ;;  %v1756_v34 = vld [vmem:[#allocation7 + $0x18] sm:$0xff]  ;;  %v1606_v63 = vld [vmem:[#allocation8 + $0x50] sm:$0xf]  ;;  %v1766_v18 = vld [vmem:[#allocation8 + $0x24] sm:$0xf0]  ;;  %s1263_s26 = sshll.u32 %s1259_s4, 4  ;;  %s1264_s26 = int_to_ptr.hbm [resolvable:$true] %s1263_s26 }
  0x5f   : > { %689 = vmatpush.bf16.msra.mxu1 %v1466_v35  ;;  %v1607_v3 = vor.u32 %v1772_v0, %v1606_v63  ;;  %v1785_v59 = vld [vmem:[#allocation10 + $0x40] sm:$0xff]  ;;  %s1249_s12 = scalar_lea.sflag [#allocation4], %s2357_s23  ;;  %s2107_s20 = sshra.s32 %s1264_s26, 4  ;;  %s2108_s20 = int_to_ptr.hbm [resolvable:$true] %s2107_s20 }
  0x60   : > { %s2109_s6 = scalar_lea.hbm %s2108_s20, 4  ;;  %s2113_s5 = scalar_lea.hbm %s2463_s10, 8 }
  0x61   : > { %p2110_p3 = scmp.ne.s32.totalorder %s2108_s20, %s2109_s6  ;;  %p2114_p8 = scmp.lt.s32.totalorder %s2108_s20, %s2463_s10 }
  0x62   : > { %677 = vmatpush.bf16.msra.mxu0 %v1450_v40  ;;  %700 = vmatpush.bf16.msra.mxu2 %v1494_v2  ;;  %v1608_v2 = vld [vmem:[#allocation8 + $0x58] sm:$0xf0]  ;;  %p2115_p7 = scmp.lt.s32.totalorder %s2113_s5, %s2109_s6 }
  0x63   : > { %690 = vmatpush.bf16.msra.mxu1 %v1454_v41  ;;  %v1611_v4 = vor.u32 %v1771_v1, %v1608_v2  ;;  %p2111_p5 = pnand %p2110_p3, %p2326_p13 }
  0x64   : > { %p2116_p9 = por %p2115_p7, %p2114_p8 }
  0x65   : > { %p2112_p12 = pneg %p2111_p5 }
  0x66   : > { %678 = vmatpush.bf16.msra.mxu0 %v1438_v46  ;;  %701 = vmatpush.bf16.msra.mxu2 %v1482_v5  ;;  %v1598_v5 = vld [vmem:[#allocation8 + $0x40] sm:$0xf] }
  0x67   : > { %691 = vmatpush.bf16.msra.mxu1 %v1442_v47  ;;  %v1599_v9 = vor.u32 %v1770_v6, %v1598_v5  ;;  %v2184_v5 = vmov 0   ;;  %v1799_v6 = vld [vmem:[#allocation11 + $0x30] sm:$0xff]  ;;  %p2117_p10 = pnand %p2116_p9, %p2112_p12 }
  0x68   : > { %1905 = vset.pattern.permute.xlu1 %v2184_v5  ;;  %1906 = vset.pattern.permute.xlu0 %v2184_v5 }
  0x69   : > { %679 = vmatmul.bf16.vlgmr.msra.gmra.mxu0 %v2389_v48 }
  0x6a   : > { %692 = vmatmul.bf16.vlgmr.msra.gmra.mxu1 %v2389_v48  ;;  %702 = vmatpush.bf16.msra.mxu2 %v1470_v8  ;;  %v1600_v8 = vld [vmem:[#allocation8 + $0x48] sm:$0xf0] }
  0x6b   : > { %v1603_v10 = vor.u32 %v1769_v7, %v1600_v8  ;;  %v1798_v7 = vld [vmem:[#allocation11 + $0x28] sm:$0xff]  ;;  %v1797_v8 = vld [vmem:[#allocation11 + $0x20] sm:$0xff] }
  0x6e   : > { %703 = vmatpush.bf16.msra.mxu2 %v1458_v12  ;;  %v1768_v12 = vld [vmem:[#allocation8 + $0x34] sm:$0xf0] }
  0x72   : > { %704 = vmatpush.bf16.msra.mxu2 %v1446_v19  ;;  %v1765_v19 = vld [vmem:[#allocation8 + $0x24] sm:$0xf] }
  0x75   : > { %705 = vmatmul.bf16.vlgmr.msra.gmra.mxu2 %v2389_v48 }
  0xe6   : > { %v680_v49 = vpop.f32.mrf.mxu0 }
  0xe7   : > { %v693_v50 = vpop.f32.mrf.mxu1  ;;  %v710_v52 = vpack.c.bf16 %v680_v49, %v680_v49 }
  0xe8   : > { %v711_v51 = vpack.c.bf16 %v693_v50, %v693_v50  ;;  %v1753_v50 = vld [vmem:[#allocation7] sm:$0xff] }
  0xea   : > { %723 = vmatpush.bf16.xpose.msra.mxu3 %v711_v51  ;;  %v1622_v51 = vld [vmem:[#allocation8 + $0x70] sm:$0xf] }
  0xee   : > { %v682_v53 = vpop.f32.mrf.mxu0 }
  0xef   : > { %v695_v54 = vpop.f32.mrf.mxu1  ;;  %v1775_v53 = vld [vmem:[#allocation8 + $0x74] sm:$0xf] }
  0xf0   : > { %v1627_v58 = vor.u32 %v1775_v53, %v1624_v55  ;;  %v1786_v53 = vld [vmem:[#allocation10 + $0x48] sm:$0xff] }
  0xf1   : > { %724 = vmatmul.bf16.vlgmr.msra.gmra.mxu3 %v710_v52  ;;  %v1776_v52 = vld [vmem:[#allocation8 + $0x74] sm:$0xf0] }
  0xf2   : > { %v1623_v54 = vor.u32 %v1776_v52, %v1622_v51  ;;  %965 = vmatpush.bf16.msrb.mxu1 %v1627_v58  ;;  %v510_v51 = vunpack.c.l.bf16 %v2389_v48  ;;  %v1778_v52 = vld [vmem:[#allocation10 + $0x8] sm:$0xff]  ;;  %v1777_v58 = vld [vmem:[#allocation10] sm:$0xff] }
  0xf4   : > { %952 = vmatpush.bf16.msrb.mxu0 %v1623_v54 }
  0xf6   : > { %966 = vmatpush.bf16.msrb.mxu1 %v1619_v62 }
  0xf8   : > { %v706_v25 = vpop.f32.mrf.mxu2  ;;  %953 = vmatpush.bf16.msrb.mxu0 %v1615_v61 }
  0xf9   : > { %v755_v27 = vpack.c.bf16 %v706_v25, %v706_v25  ;;  %v1763_v25 = vld [vmem:[#allocation8 + $0x14] sm:$0xf] }
  0xfa   : > { %967 = vmatpush.bf16.msrb.mxu1 %v1611_v4  ;;  %v1800_v4 = vld [vmem:[#allocation11 + $0x38] sm:$0xff] }
  0xfb   : > { %v761_v28 = vsel %vm759_vm1, %v755_v27, 0 }
  0xfc   : > { %770 = vmatpush.bf16.msrb.mxu3 %v761_v28  ;;  %954 = vmatpush.bf16.msrb.mxu0 %v1607_v3  ;;  %v1158_v3 = vld [vmem:[%s507_s29] sm:$0xf] }
  0xfd   : > { %1161 = vperm.xlu1 %1905, %v1158_v3  }
  0xfe   : > { %968 = vmatpush.bf16.msrb.mxu1 %v1603_v10  ;;  %v1795_v10 = vld [vmem:[#allocation11 + $0x10] sm:$0xff] }
 0x100   : > { %v708_v26 = vpop.f32.mrf.mxu2  ;;  %841 = vmatpush.bf16.msra.mxu3 %v1760_v29  ;;  %955 = vmatpush.bf16.msrb.mxu0 %v1599_v9  ;;  %v1796_v9 = vld [vmem:[#allocation11 + $0x18] sm:$0xff] }
 0x101   : > { %v1576_v26 = vld [vmem:[#allocation8 + $0x18] sm:$0xf0] }
 0x102   : > { %v1579_v29 = vor.u32 %v1763_v25, %v1576_v26 }
 0x104   : > { %842 = vmatpush.bf16.msra.mxu3 %v1759_v30 }
 0x108   : > { %843 = vmatpush.bf16.msra.mxu3 %v1758_v31 }
 0x10c   : > { %844 = vmatpush.bf16.msra.mxu3 %v1757_v33  ;;  %v1762_v33 = vld [vmem:[#allocation8 + $0x4] sm:$0xf0] }
 0x110   : > { %845 = vmatpush.bf16.msra.mxu3 %v1756_v34  ;;  %v1761_v34 = vld [vmem:[#allocation8 + $0x4] sm:$0xf] }
 0x114   : > { %846 = vmatpush.bf16.msra.mxu3 %v1755_v37 }
 0x118   : > { %847 = vmatpush.bf16.msra.mxu3 %v1754_v42  ;;  %v1782_v42 = vld [vmem:[#allocation10 + $0x28] sm:$0xff] }
 0x11c   : > { %848 = vmatpush.bf16.msra.mxu3 %v1753_v50  ;;  %v1787_v50 = vld [vmem:[#allocation10 + $0x50] sm:$0xff] }
 0x174   : > { %v725_v13 = vpop.f32.mrf.mxu3 }
 0x175   : > { %v726_v14 = vadd.f32 %v1907_v11, %v725_v13  ;;  %v1590_v11 = vld [vmem:[#allocation8 + $0x30] sm:$0xf]  ;;  %v1767_v13 = vld [vmem:[#allocation8 + $0x34] sm:$0xf] }
 0x177   : > { %v730_v15 = vsel %vm729_vm0, %v726_v14, -inf }
 0x178   : > { %731 = vmax.xlane.f32.xlu0 %v730_v15  ;;  %v1591_v15 = vor.u32 %v1768_v12, %v1590_v11 }
 0x17a   : > { %956 = vmatpush.bf16.msrb.mxu0 %v1591_v15 }
 0x17c   : > { %v727_v16 = vpop.f32.mrf.mxu3 }
 0x1eb   : > { %v732_v20 = vpop.xlane.xlu0 %731 }
 0x1ec   : > { %v733_v21 = vsub.f32 %v726_v14, %v732_v20  ;;  %v1592_v14 = vld [vmem:[#allocation8 + $0x38] sm:$0xf0]  ;;  %v1584_v20 = vld [vmem:[#allocation8 + $0x28] sm:$0xf0] }
 0x1ed   : > { %v1595_v16 = vor.u32 %v1767_v13, %v1592_v14  ;;  %v1794_v14 = vld [vmem:[#allocation11 + $0x8] sm:$0xff] }
 0x1ee   : > { %v734_v22 = vmul.f32 1.442695, %v733_v21  ;;  %v1583_v21 = vor.u32 %v1766_v18, %v1582_v17 }
 0x1ef   : > { %969 = vmatpush.bf16.msrb.mxu1 %v1595_v16 }
 0x1f0   : > { %1909 = vpow2.f32 %v734_v22  ;;  %v1587_v22 = vor.u32 %v1765_v19, %v1584_v20  ;;  %957 = vmatpush.bf16.msrb.mxu0 %v1583_v21  ;;  %v1137_v20 = vld [vmem:[%s2361_s11] sm:$0x3]  ;;  %v1793_v21 = vld [vmem:[#allocation11] sm:$0xff] }
 0x1f3   : > { %970 = vmatpush.bf16.msrb.mxu1 %v1587_v22  ;;  %v1162_v22 = vpop.permute.xlu1 %1161 }
 0x1f6   : > { %v1910_v23 = vpop.eup %1909 }
 0x1f7   : > { %v736_v24 = vsel %vm729_vm0, %v1910_v23, 0.0  ;;  %971 = vmatpush.bf16.msrb.mxu1 %v1579_v29 }
 0x1f8   : > { %737 = vadd.xlane.f32.xlu0 %v736_v24  ;;  %v1764_v24 = vld [vmem:[#allocation8 + $0x14] sm:$0xf0] }
 0x26b   : > { %v738_v32 = vpop.xlane.xlu0 %737 }
 0x26c   : > { %1911 = vrcp.f32 %v738_v32  ;;  %v750_v39 = vand.u32 2147483648, %v738_v32  ;;  %v748_v41 = vand.u32 2147483647, %v738_v32  ;;  %vm744_vm3 = vweird.f32 %v738_v32 }
 0x26e   : > { %v751_v44 = vor.u32 1.1754944e-38, %v750_v39  ;;  %vm749_vm5 = vcmp.eq.f32.partialorder %v748_v41, 8.507059e+37  ;;  %v1792_v39 = vld [vmem:[#allocation10 + $0x78] sm:$0xff]  ;;  %v1791_v41 = vld [vmem:[#allocation10 + $0x70] sm:$0xff] }
 0x272   : > { %v1912_v35 = vpop.eup %1911 }
 0x273   : > { %v740_v36 = vmul.f32 %v1912_v35, %v738_v32  ;;  %vm745_vm2 = vweird.f32 %v1912_v35  ;;  %v1566_v32 = vld [vmem:[#allocation8] sm:$0xf] }
 0x274   : > { %vm746_vm4 = vmor %vm744_vm3, %vm745_vm2 }
 0x275   : > { %v741_v38 = vsub.f32 1.0, %v740_v36  ;;  %v1568_v36 = vld [vmem:[#allocation8 + $0x8] sm:$0xf0] }
 0x276   : > { %v1571_v37 = vor.u32 %v1761_v34, %v1568_v36 }
 0x277   : > { %v742_v40 = vmul.f32 %v1912_v35, %v741_v38  ;;  %v1784_v38 = vld [vmem:[#allocation10 + $0x38] sm:$0xff] }
 0x278   : > { %972 = vmatpush.bf16.msrb.mxu1 %v1571_v37  ;;  %1110 = vmatpush.bf16.msrb.mxu2 %v1784_v38 }
 0x279   : > { %v743_v43 = vadd.f32 %v1912_v35, %v742_v40  ;;  %v1783_v40 = vld [vmem:[#allocation10 + $0x30] sm:$0xff] }
 0x27b   : > { %v747_v45 = vsel %vm746_vm4, %v1912_v35, %v743_v43  ;;  %v1567_v35 = vor.u32 %v1762_v33, %v1566_v32  ;;  %v1790_v43 = vld [vmem:[#allocation10 + $0x68] sm:$0xff] }
 0x27c   : > { %v752_v46 = vsel %vm749_vm5, %v751_v44, %v747_v45  ;;  %1111 = vmatpush.bf16.msrb.mxu2 %v1783_v40  ;;  %v1781_v44 = vld [vmem:[#allocation10 + $0x20] sm:$0xff]  ;;  %1234 = vmatpush.bf16.msra.mxu1 %v1800_v4 }
 0x27d   : > { %v753_v47 = vmul.f32 %v1910_v23, %v752_v46  ;;  %v1574_v23 = vld [vmem:[#allocation8 + $0x10] sm:$0xf]  ;;  %v1789_v45 = vld [vmem:[#allocation10 + $0x60] sm:$0xff]  ;;  %v1780_v46 = vld [vmem:[#allocation10 + $0x18] sm:$0xff] }
 0x27e   : > { %v1575_v27 = vor.u32 %v1764_v24, %v1574_v23 }
 0x27f   : > { %v754_v49 = vpack.c.bf16 %v753_v47, %v753_v47  ;;  %v1788_v47 = vld [vmem:[#allocation10 + $0x58] sm:$0xff] }
 0x280   : > { %958 = vmatpush.bf16.msrb.mxu0 %v1575_v27  ;;  %1112 = vmatpush.bf16.msrb.mxu2 %v1782_v42  ;;  %v1908_v27 = vld [vmem:[%s2462_s9] ss:$0 sm:$0xff] }
 0x281   : > { %1531 = vmatmul.msk.bf16.vlgmr.msrb.gmra.mxu3 %vm729_vm0, %v754_v49  ;;  %v1779_v49 = vld [vmem:[#allocation10 + $0x10] sm:$0xff]  ;;  %1235 = vmatpush.bf16.msra.mxu1 %v1799_v6 }
 0x282   : > { %1123 = vmatpush.bf16.msrb.mxu3 %v1792_v39 }
 0x284   : > { %959 = vmatpush.bf16.msrb.mxu0 %v1567_v35  ;;  %1113 = vmatpush.bf16.msrb.mxu2 %v1781_v44 }
 0x285   : > { %1236 = vmatpush.bf16.msra.mxu1 %v1798_v7 }
 0x286   : > { %1124 = vmatpush.bf16.msrb.mxu3 %v1791_v41 }
 0x288   : > { %1114 = vmatpush.bf16.msrb.mxu2 %v1780_v46 }
 0x289   : > { %1237 = vmatpush.bf16.msra.mxu1 %v1797_v8 }
 0x28a   : > { %1125 = vmatpush.bf16.msrb.mxu3 %v1790_v43 }
 0x28c   : > { %1115 = vmatpush.bf16.msrb.mxu2 %v1779_v49 }
 0x28d   : > { %1238 = vmatpush.bf16.msra.mxu1 %v1796_v9 }
 0x28e   : > { %1126 = vmatpush.bf16.msrb.mxu3 %v1789_v45 }
 0x290   : > { %1116 = vmatpush.bf16.msrb.mxu2 %v1778_v52 }
 0x291   : > { %1239 = vmatpush.bf16.msra.mxu1 %v1795_v10 }
 0x292   : > { %1127 = vmatpush.bf16.msrb.mxu3 %v1788_v47 }
 0x294   : > { %1117 = vmatpush.bf16.msrb.mxu2 %v1777_v58 }
 0x295   : > { %1240 = vmatpush.bf16.msra.mxu1 %v1794_v14 }
 0x296   : > { %1128 = vmatpush.bf16.msrb.mxu3 %v1787_v50 }
 0x299   : > { %1241 = vmatpush.bf16.msra.mxu1 %v1793_v21 }
 0x29a   : > { %1129 = vmatpush.bf16.msrb.mxu3 %v1786_v53 }
 0x29e   : > { %1130 = vmatpush.bf16.msrb.mxu3 %v1785_v59 }
 0x304   : > { %v772_v28 = vpop.f32.mrf.mxu3 }
 0x305   : > { %v776_v30 = vpack.c.bf16 %v772_v28, %v772_v28 }
 0x307   : > { %849 = vmatmul.bf16.vlgmr.msra.gmra.mxu3 %v776_v30 }
 0x30c   : > { %v774_v31 = vpop.f32.mrf.mxu3 }
 0x38a   : > { %v850_v54 = vpop.f32.mrf.mxu3 }
 0x38b   : > { %v854_v55 = vadd.f32 %v850_v54, %v510_v51 }
 0x38d   : > { %v855_v56 = vpack.c.bf16 %v854_v55, %v854_v55 }
 0x38f   : > { %960 = vmatmul.bf16.vlgmr.msrb.gmra.mxu0 %v855_v56  ;;  %973 = vmatmul.bf16.vlgmr.msrb.gmra.mxu1 %v855_v56 }
 0x392   : > { %v852_v57 = vpop.f32.mrf.mxu3 }
 0x40c   : > { %v961_v60 = vpop.f32.mrf.mxu0  ;;  %v974_v61 = vpop.f32.mrf.mxu1 }
 0x40d   : > { %v978_v48 = vmax.f32 %v961_v60, 0.0  ;;  %v979_v62 = vmax.f32 %v974_v61, 0.0 }
 0x40f   : > { %v980_v63 = vpack.c.bf16 %v978_v48, %v978_v48  ;;  %v981_v0 = vpack.c.bf16 %v979_v62, %v979_v62 }
 0x411   : > { %1118 = vmatmul.bf16.vlgmr.msrb.gmra.mxu2 %v980_v63  ;;  %1131 = vmatmul.bf16.vlgmr.msrb.gmra.mxu3 %v981_v0 }
 0x414   : > { %v963_v1 = vpop.f32.mrf.mxu0  ;;  %v976_v2 = vpop.f32.mrf.mxu1 }
 0x494   : > { %v1119_v11 = vpop.f32.mrf.mxu2  ;;  %v1132_v12 = vpop.f32.mrf.mxu3 }
 0x495   : > { %v1133_v13 = vadd.f32 %v1132_v12, %v1119_v11 }
 0x497   : > { %v1136_v15 = vadd.f32 %v1133_v13, %v854_v55 }
 0x499   : > { %v1138_v16 = vpack.c.bf16 %v1136_v15, %v1136_v15 }
 0x49b   : > { %v1143_v17 = vsel %vm759_vm1, %v1138_v16, 0 }
 0x49c   : > { %v1121_v18 = vpop.f32.mrf.mxu2  ;;  %v1134_v19 = vpop.f32.mrf.mxu3  ;;  %1152 = vmatpush.bf16.msra.mxu0 %v1143_v17 }
 0x49f   : > { %1692 = vmatmul.msk.bf16.vlgmr.msra.gmra.mxu0 %vm729_vm0, %v1137_v20 }
 0x51c   : > { %v1154_v23 = vpop.f32.mrf.mxu0 }
 0x51d   : > { %v1164_v24 = vmul.f32 %v1162_v22, %v1154_v23 }
 0x51f   : > { %v1165_v25 = vpack.c.bf16 %v1164_v24, %v1164_v24 }
 0x521   : > { %1242 = vmatmul.bf16.vlgmr.msra.gmra.mxu1 %v1165_v25 }
 0x524   : > { %v1156_v26 = vpop.f32.mrf.mxu0 }
 0x59e   : > { %v1243_v28 = vpop.f32.mrf.mxu1 }
 0x59f   : > { %v1244_v29 = vadd.f32 %v1908_v27, %v1243_v28 }
 0x5a1   : > { %1247 = vst [vmem:[%s496_s18] sm:$0xf] %v1244_v29 }
 0x5a2   : > { %2120 = shalt.err (!%p2117_p10)
}
 0x5a3   : > { %1823 = dma.vmem_to_hbm [thread:$0]  (%p2326_p13), %s1262_s25, 64, %s1264_s26, %s1249_s12  }
 0x5a6   : > { %v1245_v30 = vpop.f32.mrf.mxu1 }
 0x5a7 PF: > { %s1275_s23 = sand.u32 1, %s2159_s13   ;;  %p2478_p11 = scmp.ge.s32.totalorder %s2171_s16, 2 }
 0x5a8   : > { %s1276_s27 = scalar_lea.sflag [#allocation4], %s1275_s23 }
 0x5a9   : > { %p1846_p0 = pnand %p2478_p11, %p2331_p4 }
 0x5ab   : > { %p1847_p2 = pneg %p1846_p0 }
 0x5ad   : > { %2154 = dma.done.wait (%p1847_p2), %s1276_s27, 64  }
 0x5ae   : > { %2156 = vsyncadd (%p1847_p2), %s1276_s27, 4294967232  ;;  %p26_p6 = scmp.ge.s32.totalorder %s2306_s22, 4   ;;  %s2479_s13 = smov %s2163_s14 }
 0x5af   : > { %s2480_s14 = smov %s2167_s15  ;;  %s2481_s15 = smov %s2318_s28 }
 0x5b0   : > { %s2482_s16 = smov %s2306_s22  ;;  %28 = sbr.rel (!%p26_p6) target bundleno = 13 (0xd), region = 134 }
 0x5b5   :  { %1282 = vsyncpa [#allocation3], 1 }
 0x5b6   :  { %1284 = vsyncpa [#allocation3 + $0x1], 1 }
 0x5b7   :  { %1285 = vsyncpa [#allocation6], 1 }
 0x5b8   :  { %1286 = vsyncpa [#allocation9], 1 }
 0x5b9   :  { %1287 = vsyncpa [#allocation12], 1 }
 0x5ba   :  { %1288 = vsyncpa [#allocation4], 1 }
 0x5bb   :  { %1290 = vsyncpa [#allocation4 + $0x1], 1 }

</bundles_post_ra>
